<compile_context>
chip_gen: v7x
topology: tpu7x:2x2x1
jax: 0.10.0
libtpu: 0.0.40
codegen_flags: <defaults>
</compile_context>

<pallas_src>
import functools

import jax
import jax.numpy as jnp
from jax import lax
from jax.experimental import pallas as pl
from jax.experimental.pallas import tpu as pltpu


def _dice_kernel(p_ref, t_ref, num_ref, den_ref,
                 *, p_exp, r_total, tile_r, bps, needs_mask):
    s = pl.program_id(0)          # reduction-split (core) index
    k = pl.program_id(2)          # reduction step within this split

    @pl.when(k == 0)
    def _():
        num_ref[...] = jnp.zeros_like(num_ref)
        den_ref[...] = jnp.zeros_like(den_ref)

    pred = p_ref[...].astype(jnp.float32)   # (tn, tile_r, 128)
    targ = t_ref[...].astype(jnp.float32)

    # Zero out ragged / clamped-overflow rows (static check: only emitted
    # when the tiling does not cover R exactly).  Zeros are inert for p >= 1.
    if needs_mask:
        row_ids = lax.broadcasted_iota(jnp.int32, pred.shape, 1)
        global_rows = (s * bps + k) * tile_r + row_ids
        valid = global_rows < r_total
        pred = jnp.where(valid, pred, 0.0)
        targ = jnp.where(valid, targ, 0.0)

    # Denominator term: keep it on the VPU (multiplies), never exp/log.
    if p_exp == 1:
        den_t = pred + targ
    elif p_exp == 2:
        den_t = pred * pred + targ * targ
    else:
        den_t = lax.integer_pow(pred, p_exp) + lax.integer_pow(targ, p_exp)

    # Hot loop: VPU multiplies/adds + one sublane reduce; lanes stay wide.
    # The (1, tn, 128) output blocks act as VMEM-resident accumulators.
    num_ref[0] += jnp.sum(pred * targ, axis=1)   # (tn, 128)
    den_ref[0] += jnp.sum(den_t, axis=1)         # (tn, 128)


def binary_dice_loss(predict, target, *, smooth=1.0, p=2, reduction="mean",
                     max_block_bytes=4 * 1024 * 1024):
    """Pallas implementation of BinaryDiceLoss.forward."""
    assert predict.shape[0] == target.shape[0], \
        "predict & target batch size don't match"
    assert isinstance(p, int) and p >= 1, \
        "p must be a positive integer (zero-masking / integer_pow assume p >= 1)"

    n = predict.shape[0]
    pred2d = predict.reshape(n, -1)
    targ2d = target.reshape(n, -1)
    d = pred2d.shape[1]

    # Lane dim must be 128-aligned so [N, D] -> [N, R, 128] is a free reshape.
    # Only pads the small remainder when D % 128 != 0; zeros are inert (p>=1).
    lane_pad = (-d) % 128
    if lane_pad:
        pred2d = jnp.pad(pred2d, ((0, 0), (0, lane_pad)))
        targ2d = jnp.pad(targ2d, ((0, 0), (0, lane_pad)))
    r = (d + lane_pad) // 128
    pred3d = pred2d.reshape(n, r, 128)
    targ3d = targ2d.reshape(n, r, 128)

    # Batch blocking: full batch when small, otherwise 8-row blocks (keeps the
    # output block's second-to-last dim either == full extent or a multiple
    # of 8, satisfying the (8, 128) layout rule).
    tn = n if n <= 8 else 8
    batch_blocks = pl.cdiv(n, tn)

    # Pick tile_r (multiple of 8) so each input block is ~max_block_bytes.
    max_block_elems = max_block_bytes // 4          # f32 accumulation
    tile_r = max(8, (max_block_elems // (tn * 128)) // 8 * 8)
    tile_r = min(tile_r, ((r + 7) // 8) * 8)
    r_blocks = pl.cdiv(r, tile_r)

    # Split the reduction axis across TensorCores only when the batch axis
    # alone cannot occupy both v7x cores.  Each split writes partial sums;
    # they are combined (cheaply) in the wrapper below.
    ncs = 2 if (batch_blocks == 1 and r_blocks >= 2) else 1
    bps = pl.cdiv(r_blocks, ncs)                    # reduction blocks per split

    needs_mask = (ncs * bps * tile_r) != r

    if ncs == 1:
        def in_map(s, i, k):
            return (i, k, 0)
    else:
        def in_map(s, i, k):
            # Clamp overflow chunk indices of the last split into bounds; the
            # kernel zero-masks their (duplicate) contribution.
            kb = jnp.minimum(s * bps + k, r_blocks - 1)
            return (i, kb, 0)

    def out_map(s, i, k):
        return (s, i, 0)

    kernel = functools.partial(_dice_kernel, p_exp=p, r_total=r,
                               tile_r=tile_r, bps=bps, needs_mask=needs_mask)

    num_part, den_part = pl.pallas_call(
        kernel,
        out_shape=(jax.ShapeDtypeStruct((ncs, n, 128), jnp.float32),
                   jax.ShapeDtypeStruct((ncs, n, 128), jnp.float32)),
        grid_spec=pltpu.PrefetchScalarGridSpec(
            num_scalar_prefetch=0,
            grid=(ncs, batch_blocks, bps),
            in_specs=[
                pl.BlockSpec((tn, tile_r, 128), in_map),
                pl.BlockSpec((tn, tile_r, 128), in_map),
            ],
            out_specs=[
                pl.BlockSpec((1, tn, 128), out_map),
                pl.BlockSpec((1, tn, 128), out_map),
            ],
        ),
        compiler_params=pltpu.CompilerParams(
            # Reduction (R) axis last + sequential (accumulator pattern);
            # split + batch axes parallel so megacore chips shard the rows
            # (or halves of the reduction) across their TensorCores.
            dimension_semantics=("parallel", "parallel", "arbitrary"),
            vmem_limit_bytes=48 * 1024 * 1024,
        ),
    )(pred3d, targ3d)

    # Tiny epilogue in plain JAX: combine partial sums, smooth, divide.
    num = jnp.sum(num_part, axis=(0, 2)) + smooth   # (n,)
    den = jnp.sum(den_part, axis=(0, 2)) + smooth   # (n,)
    loss = 1.0 - num / den

    if reduction == "mean":
        return jnp.mean(loss)
    elif reduction == "sum":
        return jnp.sum(loss)
    elif reduction == "none":
        return loss
    else:
        raise Exception("Unexpected reduction {}".format(reduction))


def _reference(predict, target, smooth=1.0, p=2, reduction="mean"):
    n = predict.shape[0]
    pr = predict.reshape(n, -1).astype(jnp.float32)
    tg = target.reshape(n, -1).astype(jnp.float32)
    num = jnp.sum(pr * tg, axis=1) + smooth
    den = jnp.sum(pr**p + tg**p, axis=1) + smooth
    loss = 1.0 - num / den
    if reduction == "mean":
        return loss.mean()
    if reduction == "sum":
        return loss.sum()
    return loss


if __name__ == "__main__":
    key = jax.random.PRNGKey(0)
    k1, k2 = jax.random.split(key)
    # [N, C, H, W] = [2, 4, 16, 16]; sigmoid-like probs for predict, 0/1 target
    predict = jax.nn.sigmoid(jax.random.normal(k1, (2, 4, 16, 16), jnp.float32))
    target = (jax.random.uniform(k2, (2, 4, 16, 16)) > 0.5).astype(jnp.float32)

    out = jax.block_until_ready(
        binary_dice_loss(predict, target, smooth=1.0, p=2, reduction="mean"))
    ref = _reference(predict, target)
    assert jnp.allclose(out, ref, atol=1e-5, rtol=1e-5), (out, ref)

    # 'none' / 'sum' reductions and p=1 on the same inputs.
    out_none = jax.block_until_ready(
        binary_dice_loss(predict, target, reduction="none"))
    ref_none = _reference(predict, target, reduction="none")
    assert jnp.allclose(out_none, ref_none, atol=1e-5, rtol=1e-5)
    out_p1 = jax.block_until_ready(
        binary_dice_loss(predict, target, p=1, reduction="sum"))
    ref_p1 = _reference(predict, target, p=1, reduction="sum")
    assert jnp.allclose(out_p1, ref_p1, atol=1e-5, rtol=1e-5)

    # Exercise the split-reduction (2 "cores"), clamped index_map and ragged
    # mask path at a small shape by shrinking the block-size cap.
    k3, k4 = jax.random.split(k2)
    predict2 = jax.nn.sigmoid(jax.random.normal(k3, (2, 3, 32, 32), jnp.float32))
    target2 = (jax.random.uniform(k4, (2, 3, 32, 32)) > 0.5).astype(jnp.float32)
    out2 = jax.block_until_ready(
        binary_dice_loss(predict2, target2, max_block_bytes=8192))
    ref2 = _reference(predict2, target2)
    assert jnp.allclose(out2, ref2, atol=1e-5, rtol=1e-5), (out2, ref2)

    print("KERNEL_OK")
</pallas_src>

<mosaic_0001>
module attributes {stable_mosaic.version = 11 : i64} {
  func.func @_dice_kernel(%arg0: i32, %arg1: i32, %arg2: i32, %arg3: memref<2x8x128xf32, #tpu.memory_space<vmem>>, %arg4: memref<2x8x128xf32, #tpu.memory_space<vmem>>, %arg5: memref<1x2x128xf32, #tpu.memory_space<vmem>>, %arg6: memref<1x2x128xf32, #tpu.memory_space<vmem>>) attributes {dimension_semantics = [#tpu.dimension_semantics<parallel>, #tpu.dimension_semantics<parallel>, #tpu.dimension_semantics<arbitrary>], iteration_bounds = array<i64: 1, 1, 1>, scalar_prefetch = 0 : i64, scratch_operands = 0 : i64, tpu.core_type = #tpu.core_type<tc>, window_params = [{transform_indices = @transform_0, window_bounds = array<i64: 2, 8, 128>}, {transform_indices = @transform_1, window_bounds = array<i64: 2, 8, 128>}, {transform_indices = @transform_2, window_bounds = array<i64: 1, 2, 128>}, {transform_indices = @transform_3, window_bounds = array<i64: 1, 2, 128>}]} {
    %c0_i32 = arith.constant 0 : i32
    %0 = arith.cmpi eq, %arg2, %c0_i32 : i32
    %1 = arith.extui %0 : i1 to i32
    %c0_i32_0 = arith.constant 0 : i32
    %2 = arith.cmpi ne, %1, %c0_i32_0 : i32
    scf.if %2 {
      %cst_19 = arith.constant 0.000000e+00 : f32
      %23 = vector.broadcast %cst_19 : f32 to vector<1x2x128xf32>
      %c0_20 = arith.constant 0 : index
      %c0_21 = arith.constant 0 : index
      %c0_22 = arith.constant 0 : index
      %24 = vector.load %arg5[%c0_20, %c0_21, %c0_22] : memref<1x2x128xf32, #tpu.memory_space<vmem>>, vector<1x2x128xf32>
      tpu.vector_store %arg5[%c0_20, %c0_21, %c0_22], %23 {strides = array<i32>} : memref<1x2x128xf32, #tpu.memory_space<vmem>>, vector<1x2x128xf32>,
      %cst_23 = arith.constant 0.000000e+00 : f32
      %25 = vector.broadcast %cst_23 : f32 to vector<1x2x128xf32>
      %c0_24 = arith.constant 0 : index
      %c0_25 = arith.constant 0 : index
      %c0_26 = arith.constant 0 : index
      %26 = vector.load %arg6[%c0_24, %c0_25, %c0_26] : memref<1x2x128xf32, #tpu.memory_space<vmem>>, vector<1x2x128xf32>
      tpu.vector_store %arg6[%c0_24, %c0_25, %c0_26], %25 {strides = array<i32>} : memref<1x2x128xf32, #tpu.memory_space<vmem>>, vector<1x2x128xf32>,
    } else {
    }
    %c0 = arith.constant 0 : index
    %c0_1 = arith.constant 0 : index
    %c0_2 = arith.constant 0 : index
    %3 = vector.load %arg3[%c0, %c0_1, %c0_2] : memref<2x8x128xf32, #tpu.memory_space<vmem>>, vector<2x8x128xf32>
    %c0_3 = arith.constant 0 : index
    %c0_4 = arith.constant 0 : index
    %c0_5 = arith.constant 0 : index
    %4 = vector.load %arg4[%c0_3, %c0_4, %c0_5] : memref<2x8x128xf32, #tpu.memory_space<vmem>>, vector<2x8x128xf32>
    %5 = arith.mulf %3, %3 : vector<2x8x128xf32>
    %6 = arith.mulf %4, %4 : vector<2x8x128xf32>
    %7 = arith.addf %5, %6 : vector<2x8x128xf32>
    %c0_6 = arith.constant 0 : index
    %c0_7 = arith.constant 0 : index
    %c0_8 = arith.constant 0 : index
    %8 = vector.load %arg5[%c0_6, %c0_7, %c0_8] : memref<1x2x128xf32, #tpu.memory_space<vmem>>, vector<1x2x128xf32>
    %9 = vector.shape_cast %8 : vector<1x2x128xf32> to vector<2x128xf32>
    %10 = arith.mulf %3, %4 : vector<2x8x128xf32>
    %cst = arith.constant dense<0.000000e+00> : vector<2x128xf32>
    %11 = vector.multi_reduction <add>, %10, %cst [1] : vector<2x8x128xf32> to vector<2x128xf32>
    %12 = arith.addf %9, %11 : vector<2x128xf32>
    %c0_9 = arith.constant 0 : index
    %c0_10 = arith.constant 0 : index
    %c0_11 = arith.constant 0 : index
    %13 = vector.load %arg5[%c0_9, %c0_10, %c0_11] : memref<1x2x128xf32, #tpu.memory_space<vmem>>, vector<1x2x128xf32>
    %14 = vector.shape_cast %13 : vector<1x2x128xf32> to vector<2x128xf32>
    %15 = vector.shape_cast %12 : vector<2x128xf32> to vector<1x2x128xf32>
    tpu.vector_store %arg5[%c0_9, %c0_10, %c0_11], %15 {strides = array<i32>} : memref<1x2x128xf32, #tpu.memory_space<vmem>>, vector<1x2x128xf32>,
    %c0_12 = arith.constant 0 : index
    %c0_13 = arith.constant 0 : index
    %c0_14 = arith.constant 0 : index
    %16 = vector.load %arg6[%c0_12, %c0_13, %c0_14] : memref<1x2x128xf32, #tpu.memory_space<vmem>>, vector<1x2x128xf32>
    %17 = vector.shape_cast %16 : vector<1x2x128xf32> to vector<2x128xf32>
    %cst_15 = arith.constant dense<0.000000e+00> : vector<2x128xf32>
    %18 = vector.multi_reduction <add>, %7, %cst_15 [1] : vector<2x8x128xf32> to vector<2x128xf32>
    %19 = arith.addf %17, %18 : vector<2x128xf32>
    %c0_16 = arith.constant 0 : index
    %c0_17 = arith.constant 0 : index
    %c0_18 = arith.constant 0 : index
    %20 = vector.load %arg6[%c0_16, %c0_17, %c0_18] : memref<1x2x128xf32, #tpu.memory_space<vmem>>, vector<1x2x128xf32>
    %21 = vector.shape_cast %20 : vector<1x2x128xf32> to vector<2x128xf32>
    %22 = vector.shape_cast %19 : vector<2x128xf32> to vector<1x2x128xf32>
    tpu.vector_store %arg6[%c0_16, %c0_17, %c0_18], %22 {strides = array<i32>} : memref<1x2x128xf32, #tpu.memory_space<vmem>>, vector<1x2x128xf32>,
    return
  }
  func.func @transform_0(%arg0: i32, %arg1: i32, %arg2: i32) -> (i32, i32, i32) {
    %c0_i32 = arith.constant 0 : i32
    %c0_i32_0 = arith.constant 0 : i32
    return %arg1, %arg2, %c0_i32 : i32, i32, i32
  }
  func.func @transform_1(%arg0: i32, %arg1: i32, %arg2: i32) -> (i32, i32, i32) {
    %c0_i32 = arith.constant 0 : i32
    %c0_i32_0 = arith.constant 0 : i32
    return %arg1, %arg2, %c0_i32 : i32, i32, i32
  }
  func.func @transform_2(%arg0: i32, %arg1: i32, %arg2: i32) -> (i32, i32, i32) {
    %c0_i32 = arith.constant 0 : i32
    %c0_i32_0 = arith.constant 0 : i32
    return %arg0, %arg1, %c0_i32 : i32, i32, i32
  }
  func.func @transform_3(%arg0: i32, %arg1: i32, %arg2: i32) -> (i32, i32, i32) {
    %c0_i32 = arith.constant 0 : i32
    %c0_i32_0 = arith.constant 0 : i32
    return %arg0, %arg1, %c0_i32 : i32, i32, i32
  }
}

</mosaic_0001>

<bundles_post_ra>
// kernel: tpu_custom_call.1
= control target key start
LH: loop header
LB: loop body
LE: loop exit
PB: predicated region body
PF: predicated region fallthrough
CT: control target
= control target key end

     0   :  { %9 = vsyncpa [#allocation3], 0  ;;  %s308_s0 = inlined_call_operand.hbm [shape: f32[2,8,128], index: 0, kind: input, shape index: {}]   ;;  %s309_s1 = inlined_call_operand.hbm [shape: f32[2,8,128], index: 1, kind: input, shape index: {}]   ;;  %s310_s2 = inlined_call_operand.hbm [shape: f32[1,2,128], index: 2, kind: output, shape index: {0}]   ;;  %s311_s3 = inlined_call_operand.hbm [shape: f32[1,2,128], index: 3, kind: output, shape index: {1}]  }
   0x1   :  { %10 = vsyncpa [#allocation6], 0 }
   0x2   :  { %11 = vsyncpa [#allocation4], 0 }
   0x3   :  { %12 = vsyncpa [#allocation9], 0  ;;  %s233_s12 = smov [#allocation2]   ;;  %s137_s16 = scalar_lea.hbm %s308_s0, 256 }
   0x4   :  { %s18_s13 = sshll.u32 %s233_s12, 4  ;;  %p138_p0 = scmp.ne.s32.totalorder %s308_s0, %s137_s16  ;;  %s19_s13 = int_to_ptr.vmem [resolvable:$true] %s18_s13 }
   0x5   :  { %p141_p1 = scmp.lt.u32.totalorder %s137_s16, %s308_s0 }
   0x7   :  { %p143_p2 = pnand %p141_p1, %p138_p0 }
   0x9   :  { %146 = shalt.err (!%p143_p2)
}
   0xa   :  { %s147_s21 = scalar_lea.vmem %s19_s13, 256  ;;  %p152_p4 = scmp.lt.s32.totalorder %s19_s13, %s19_s13 }
   0xb   :  { %p148_p3 = scmp.ne.s32.totalorder %s19_s13, %s147_s21  ;;  %p153_p5 = scmp.lt.s32.totalorder %s147_s21, %s147_s21 }
   0xd   :  { %p154_p6 = por %p153_p5, %p152_p4 }
   0xf   :  { %p155_p7 = pnand %p154_p6, %p148_p3 }
  0x11   :  { %158 = shalt.err (!%p155_p7)
}
  0x12   :  { %s234_s22 = smov 128   ;;  %s235_s23 = smov 8  }
  0x13   :  { %24 = dma.hbm_to_vmem [thread:$0]  %s308_s0, 256, %s19_s13, [#allocation3], %s234_s22, %s234_s22, %s235_s23  }
  0x14   :  { %s236_s26 = smov [#allocation5]   ;;  %s159_s30 = scalar_lea.hbm %s309_s1, 256 }
  0x15   :  { %s30_s27 = sshll.u32 %s236_s26, 4  ;;  %p160_p8 = scmp.ne.s32.totalorder %s309_s1, %s159_s30  ;;  %s31_s27 = int_to_ptr.vmem [resolvable:$true] %s30_s27 }
  0x16   :  { %p163_p9 = scmp.lt.u32.totalorder %s159_s30, %s309_s1 }
  0x18   :  { %p165_p10 = pnand %p163_p9, %p160_p8 }
  0x1a   :  { %168 = shalt.err (!%p165_p10)
}
  0x1b   :  { %s169_s8 = scalar_lea.vmem %s31_s27, 256  ;;  %p174_p12 = scmp.lt.s32.totalorder %s31_s27, %s31_s27 }
  0x1c   :  { %p170_p11 = scmp.ne.s32.totalorder %s31_s27, %s169_s8  ;;  %p175_p13 = scmp.lt.s32.totalorder %s169_s8, %s169_s8 }
  0x1e   :  { %p176_p0 = por %p175_p13, %p174_p12 }
  0x20   :  { %p177_p1 = pnand %p176_p0, %p170_p11 }
  0x22   :  { %180 = shalt.err (!%p177_p1)
}
  0x23   :  { %36 = dma.hbm_to_vmem [thread:$0]  %s309_s1, 256, %s31_s27, [#allocation6], %s234_s22, %s234_s22, %s235_s23  }
  0x24   :  { %225 = dma.done.wait [#allocation3], 256  }
  0x25   :  { %226 = vsyncadd [#allocation3], 4294967040 }
  0x26   :  { %227 = dma.done.wait [#allocation6], 256  }
  0x27   :  { %228 = vsyncadd [#allocation6], 4294967040  ;;  %v237_v0 = vmov 0.0   ;;  %v49_v1 = vld [vmem:[#allocation2] sm:$0xff]  ;;  %v50_v2 = vld [vmem:[#allocation2 + $0x8] sm:$0xff]  ;;  %vm76_vm0 = vcmask 1041409  }
  0x28   :  { %47 = vst [vmem:[#allocation7] sm:$0x3] %v237_v0  ;;  %48 = vst [vmem:[#allocation8] sm:$0x3] %v237_v0  ;;  %v51_v3 = vld [vmem:[#allocation5] sm:$0xff]  ;;  %v52_v4 = vld [vmem:[#allocation5 + $0x8] sm:$0xff]  ;;  %v53_v6 = vmul.f32 %v49_v1, %v49_v1  ;;  %v54_v7 = vmul.f32 %v50_v2, %v50_v2 }
  0x29   :  { %v60_v5 = vmul.f32 %v51_v3, %v49_v1  ;;  %v55_v8 = vmul.f32 %v51_v3, %v51_v3  ;;  %v61_v9 = vmul.f32 %v52_v4, %v50_v2  ;;  %v56_v10 = vmul.f32 %v52_v4, %v52_v4  ;;  %s238_s1 = smov [#allocation7]   ;;  %s239_s11 = smov [#allocation8]  }
  0x2a   :  { %s106_s10 = sshll.u32 %s238_s1, 4  ;;  %s116_s12 = sshll.u32 %s239_s11, 4  ;;  %s107_s10 = int_to_ptr.vmem [resolvable:$true] %s106_s10  ;;  %s117_s12 = int_to_ptr.vmem [resolvable:$true] %s116_s12 }
  0x2b   :  { %v62_v11 = vrot.slane %v60_v5, 4  ;;  %v57_v12 = vadd.f32 %v55_v8, %v53_v6  ;;  %v68_v13 = vrot.slane %v61_v9, 4  ;;  %v58_v14 = vadd.f32 %v56_v10, %v54_v7  ;;  %s181_s13 = scalar_lea.vmem %s107_s10, 32  ;;  %p186_p3 = scmp.lt.s32.totalorder %s107_s10, %s107_s10 }
  0x2c   :  { %p182_p2 = scmp.ne.s32.totalorder %s107_s10, %s181_s13  ;;  %p187_p4 = scmp.lt.s32.totalorder %s181_s13, %s181_s13 }
  0x2d   :  { %v63_v15 = vadd.f32 %v62_v11, %v60_v5  ;;  %v82_v16 = vrot.slane %v57_v12, 4  ;;  %v69_v17 = vadd.f32 %v68_v13, %v61_v9  ;;  %v88_v18 = vrot.slane %v58_v14, 4 }
  0x2e   :  { %p188_p5 = por %p187_p4, %p186_p3 }
  0x2f   :  { %v64_v19 = vrot.slane %v63_v15, 2  ;;  %v83_v20 = vadd.f32 %v82_v16, %v57_v12  ;;  %v70_v21 = vrot.slane %v69_v17, 2  ;;  %v89_v22 = vadd.f32 %v88_v18, %v58_v14  ;;  %v59_v33 = vld [vmem:[#allocation7] sm:$0x3]  ;;  %v81_v38 = vld [vmem:[#allocation8] sm:$0x3] }
  0x30   :  { %p189_p6 = pnand %p188_p5, %p182_p2 }
  0x31   :  { %v65_v23 = vadd.f32 %v64_v19, %v63_v15  ;;  %v84_v24 = vrot.slane %v83_v20, 2  ;;  %v71_v25 = vadd.f32 %v70_v21, %v69_v17  ;;  %v90_v26 = vrot.slane %v89_v22, 2 }
  0x33   :  { %v66_v27 = vrot.slane %v65_v23, 1  ;;  %v85_v28 = vadd.f32 %v84_v24, %v83_v20  ;;  %v72_v29 = vrot.slane %v71_v25, 1  ;;  %v91_v30 = vadd.f32 %v90_v26, %v89_v22 }
  0x35   :  { %v67_v31 = vadd.f32 %v66_v27, %v65_v23  ;;  %v86_v32 = vrot.slane %v85_v28, 1  ;;  %v73_v34 = vadd.f32 %v72_v29, %v71_v25  ;;  %v92_v35 = vrot.slane %v91_v30, 1 }
  0x37   :  { %v87_v36 = vadd.f32 %v86_v32, %v85_v28  ;;  %v77_v37 = vsel %vm76_vm0, %v73_v34, %v67_v31  ;;  %v93_v39 = vadd.f32 %v92_v35, %v91_v30 }
  0x38   :  { %v79_v40 = vadd.f32 %v77_v37, %v59_v33 }
  0x39   :  { %v96_v41 = vsel %vm76_vm0, %v93_v39, %v87_v36 }
  0x3a   :  { %80 = vst [vmem:[#allocation7] sm:$0x3] %v79_v40  ;;  %v98_v42 = vadd.f32 %v96_v41, %v81_v38 }
  0x3b   :  { %192 = shalt.err (!%p189_p6)
}
  0x3c   :  { %s193_s16 = scalar_lea.hbm %s310_s2, 32 }
  0x3d   :  { %p194_p7 = scmp.ne.s32.totalorder %s310_s2, %s193_s16  ;;  %p197_p8 = scmp.lt.u32.totalorder %s193_s16, %s310_s2 }
  0x3f   :  { %p199_p9 = pnand %p197_p8, %p194_p7 }
  0x41   :  { %202 = shalt.err (!%p199_p9)
}
  0x42   :  { %109 = dma.vmem_to_hbm [thread:$0]  %s107_s10, 32, %s310_s2, [#allocation4]   ;;  %99 = vst [vmem:[#allocation8] sm:$0x3] %v98_v42 }
  0x43   :  { %s203_s23 = scalar_lea.vmem %s117_s12, 32  ;;  %p208_p11 = scmp.lt.s32.totalorder %s117_s12, %s117_s12 }
  0x44   :  { %p204_p10 = scmp.ne.s32.totalorder %s117_s12, %s203_s23  ;;  %p209_p12 = scmp.lt.s32.totalorder %s203_s23, %s203_s23 }
  0x46   :  { %p210_p13 = por %p209_p12, %p208_p11 }
  0x48   :  { %p211_p0 = pnand %p210_p13, %p204_p10 }
  0x4a   :  { %214 = shalt.err (!%p211_p0)
}
  0x4b   :  { %s215_s26 = scalar_lea.hbm %s311_s3, 32 }
  0x4c   :  { %p216_p1 = scmp.ne.s32.totalorder %s311_s3, %s215_s26  ;;  %p219_p2 = scmp.lt.u32.totalorder %s215_s26, %s311_s3 }
  0x4e   :  { %p221_p3 = pnand %p219_p2, %p216_p1 }
  0x50   :  { %224 = shalt.err (!%p221_p3)
}
  0x51   :  { %119 = dma.vmem_to_hbm [thread:$0]  %s117_s12, 32, %s311_s3, [#allocation9]  }
  0x52   :  { %229 = dma.done.wait [#allocation4], 32  }
  0x53   :  { %230 = vsyncadd [#allocation4], 4294967264 }
  0x54   :  { %231 = dma.done.wait [#allocation9], 32  }
  0x55   :  { %232 = vsyncadd [#allocation9], 4294967264 }
  0x56   :  { %126 = vsyncpa [#allocation3], 1 }
  0x57   :  { %127 = vsyncpa [#allocation6], 1 }
  0x58   :  { %128 = vsyncpa [#allocation4], 1 }
  0x59   :  { %129 = vsyncpa [#allocation9], 1 }

</bundles_post_ra>
